<compile_context>
chip_gen: v7x
topology: tpu7x:2x2x1
jax: 0.10.0
libtpu: 0.0.40
codegen_flags: <defaults>
</compile_context>

<pallas_src>
import math
import functools

import jax
import jax.numpy as jnp
from jax.experimental import pallas as pl
from jax.experimental.pallas import tpu as pltpu

_LANES = 128
_SUBLANES = 8
_MAX_TILE_ROWS = 1024   # (1024,128) f32 tile = 512 KiB; 3 arrays x 2 buffers ~ 3 MiB VMEM
                        # -> fits comfortably under the scoped VMEM default on v5e/v6e/v7x.


# ---------------------------------------------------------------------------
# Kernel 1: EMA parameter update   ema <- a*ema + (1-a)*p   (row-tiled elementwise)
# ---------------------------------------------------------------------------
def _ema_update_kernel(alphas_ref, ema_ref, p_ref, out_ref):
    a = alphas_ref[0]    # decay
    om = alphas_ref[1]   # (1 - decay), hoisted out of the per-tile path
    out_ref[...] = a * ema_ref[...] + om * p_ref[...]


@functools.partial(jax.jit, static_argnames=("tile_rows",), donate_argnums=(1,))
def ema_update_flat(alphas, ema_slab, p_slab, *, tile_rows):
    """EMA lerp on a padded [rows, 128] f32 slab, pipelined over row tiles.

    The ema slab is donated and aliased to the output -> in-place update in HBM.
    """
    rows, lanes = ema_slab.shape
    grid = (rows // tile_rows,)
    return pl.pallas_call(
        _ema_update_kernel,
        out_shape=jax.ShapeDtypeStruct((rows, lanes), jnp.float32),
        grid_spec=pltpu.PrefetchScalarGridSpec(
            num_scalar_prefetch=0,
            grid=grid,
            in_specs=[
                pl.BlockSpec(memory_space=pltpu.SMEM),                # [a, 1-a]
                pl.BlockSpec((tile_rows, lanes), lambda i: (i, 0)),   # ema tile
                pl.BlockSpec((tile_rows, lanes), lambda i: (i, 0)),   # live-param tile
            ],
            out_specs=pl.BlockSpec((tile_rows, lanes), lambda i: (i, 0)),
        ),
        compiler_params=pltpu.CompilerParams(
            dimension_semantics=("parallel",),   # shards across both TCs on v7x
        ),
        input_output_aliases={1: 0},             # write back into the ema slab
    )(alphas, ema_slab, p_slab)


# ---------------------------------------------------------------------------
# Kernel 2: forward of the wrapped model (1x1 conv), lane-dense layout
# ---------------------------------------------------------------------------
def _conv1x1_kernel(x_ref, w_ref, b_ref, o_ref):
    # x: (1, C_in, TS) ; w: (C_out, C_in) ; b: (C_out, 1) ; o: (1, C_out, TS)
    x = x_ref[0]                  # (C_in, TS) -- spatial sits on lanes
    wv = w_ref[...]               # (C_out, C_in)
    c_in = wv.shape[1]
    if c_in <= 8:
        # Tiny contraction: broadcast FMAs on the VPU instead of a K=4 MXU matmul.
        acc = wv[:, 0:1] * x[0:1, :]
        for c in range(1, c_in):
            acc = acc + wv[:, c:c + 1] * x[c:c + 1, :]
    else:
        acc = jnp.dot(wv, x, preferred_element_type=jnp.float32)
    o_ref[0] = (acc + b_ref[...]).astype(o_ref.dtype)


def conv1x1_forward(x_nchw, weight_oihw, bias, *, spatial_tile=512):
    """1x1 Conv2d forward, NCHW in / NCHW out.

    Computes y[n, C_out, H*W] = w @ x[n] + b so output stores are lane-dense; the
    NCHW layout already gives x[n] as a contiguous [C_in, H*W] slab, so the wrapper
    only reshapes (no transposes). Spatial is tiled over the grid; w and b stay
    resident across iterations.
    """
    n, c_in, h, w = x_nchw.shape
    c_out = weight_oihw.shape[0]
    hw = h * w

    ts = hw if hw <= spatial_tile else spatial_tile    # spatial_tile is a multiple of 128
    grid = (n, pl.cdiv(hw, ts))

    x3 = x_nchw.reshape(n, c_in, hw)                   # pure reshape (view)
    w_mat = weight_oihw.reshape(c_out, c_in)
    b_col = bias.reshape(c_out, 1)

    y3 = pl.pallas_call(
        _conv1x1_kernel,
        out_shape=jax.ShapeDtypeStruct((n, c_out, hw), jnp.float32),
        grid_spec=pltpu.PrefetchScalarGridSpec(
            num_scalar_prefetch=0,
            grid=grid,
            in_specs=[
                pl.BlockSpec((1, c_in, ts), lambda b, s: (b, 0, s)),
                pl.BlockSpec((c_out, c_in), lambda b, s: (0, 0)),
                pl.BlockSpec((c_out, 1), lambda b, s: (0, 0)),
            ],
            out_specs=pl.BlockSpec((1, c_out, ts), lambda b, s: (b, 0, s)),
        ),
        compiler_params=pltpu.CompilerParams(
            dimension_semantics=("parallel", "parallel"),
        ),
    )(x3, w_mat, b_col)

    return y3.reshape(n, c_out, h, w)                  # pure reshape back to NCHW


# ---------------------------------------------------------------------------
# Packed-slab helpers + ModelEMA
# ---------------------------------------------------------------------------
def _pack_params(params, rows, lanes=_LANES):
    """Flatten + concat params into a zero-padded [rows, lanes] f32 slab."""
    flat = jnp.concatenate([jnp.ravel(p).astype(jnp.float32) for p in params])
    flat = jnp.pad(flat, (0, rows * lanes - flat.shape[0]))
    return flat.reshape(rows, lanes)


def _unpack_params(slab, templates):
    flat = slab.reshape(-1)
    out, off = [], 0
    for t in templates:
        num = math.prod(t.shape) if t.shape else 1
        out.append(flat[off:off + num].reshape(t.shape).astype(t.dtype))
        off += num
    return out


class ModelEMA:
    """EMA wrapper around a 1x1-conv model.

    EMA state lives permanently in packed [rows, 128] slab form, so update() is a
    single tiled Pallas lerp plus one pack of the incoming live params; parameters
    are unpacked lazily (and cached) only when forward() needs them.
    """

    def __init__(self, model_params, decay: float):
        self.alpha = float(decay)
        self.num_updates = 0
        self._templates = [jax.ShapeDtypeStruct(p.shape, p.dtype) for p in model_params]
        total = sum(math.prod(t.shape) if t.shape else 1 for t in self._templates)
        rows = -(-max(total, 1) // _LANES)                     # ceil(total / 128)
        rows = -(-rows // _SUBLANES) * _SUBLANES               # round up to 8 sublanes
        self._tile_rows = min(_MAX_TILE_ROWS, rows)
        self._rows = -(-rows // self._tile_rows) * self._tile_rows
        self.ema_slab = _pack_params(model_params, self._rows)
        self._cached_params = [jnp.asarray(p) for p in model_params]

    def update(self, model_params):
        assert len(model_params) == len(self._templates), "param count mismatch"
        for p, t in zip(model_params, self._templates):
            assert tuple(p.shape) == tuple(t.shape), "param layout mismatch"
        a = min(self.alpha, (1 + self.num_updates) / (10 + self.num_updates))
        alphas = jnp.asarray([a, 1.0 - a], dtype=jnp.float32)
        p_slab = _pack_params(model_params, self._rows)
        self.ema_slab = ema_update_flat(
            alphas, self.ema_slab, p_slab, tile_rows=self._tile_rows
        )
        self._cached_params = None       # invalidate; unpack lazily on demand
        self.num_updates += 1

    def params(self):
        if self._cached_params is None:
            self._cached_params = _unpack_params(self.ema_slab, self._templates)
        return self._cached_params

    def __call__(self, x_nchw):
        weight, bias = self.params()
        return conv1x1_forward(x_nchw, weight, bias)


# ---------------------------------------------------------------------------
if __name__ == "__main__":
    key = jax.random.PRNGKey(0)
    k_x, k_w, k_b, k_w2, k_b2 = jax.random.split(key, 5)

    N, C_IN, H, W, C_OUT = 2, 4, 16, 16, 8

    # EMA ("shadow") model params: 1x1 Conv2d weight [C_out, C_in, 1, 1], bias [C_out]
    weight = jax.random.normal(k_w, (C_OUT, C_IN, 1, 1), dtype=jnp.float32) * 0.1
    bias = jax.random.normal(k_b, (C_OUT,), dtype=jnp.float32) * 0.1
    model_params = [weight, bias]

    # "Live" model params (what update() pulls in during training)
    weight2 = jax.random.normal(k_w2, (C_OUT, C_IN, 1, 1), dtype=jnp.float32) * 0.1
    bias2 = jax.random.normal(k_b2, (C_OUT,), dtype=jnp.float32) * 0.1
    live_params = [weight2, bias2]

    x = jax.random.normal(k_x, (N, C_IN, H, W), dtype=jnp.float32)

    ema = ModelEMA(model_params, decay=0.999)

    # One EMA update step (alpha = min(0.999, 1/10) = 0.1 at num_updates=0)
    ema.update(live_params)

    # Reference check of the update
    a_ref = min(0.999, 1.0 / 10.0)
    w_ref = a_ref * weight + (1 - a_ref) * weight2
    b_ref = a_ref * bias + (1 - a_ref) * bias2
    w_ema, b_ema = ema.params()
    assert jnp.allclose(w_ema, w_ref, atol=1e-6)
    assert jnp.allclose(b_ema, b_ref, atol=1e-6)

    # Forward pass through the EMA model (Pallas lane-dense conv kernel)
    y = ema(x)
    y = jax.block_until_ready(y)

    # Reference forward: 1x1 conv as einsum
    y_ref = (
        jnp.einsum("nchw,oc->nohw", x, w_ref.reshape(C_OUT, C_IN))
        + b_ref[None, :, None, None]
    )
    assert y.shape == (N, C_OUT, H, W)
    assert jnp.allclose(y, y_ref, atol=1e-5)

    print("KERNEL_OK")
</pallas_src>

<mosaic_0001>
module attributes {stable_mosaic.version = 11 : i64} {
  func.func @_ema_update_kernel(%arg0: i32, %arg1: memref<2xf32, #tpu.memory_space<smem>>, %arg2: memref<8x128xf32, #tpu.memory_space<vmem>>, %arg3: memref<8x128xf32, #tpu.memory_space<vmem>>, %arg4: memref<8x128xf32, #tpu.memory_space<vmem>>) attributes {dimension_semantics = [#tpu.dimension_semantics<parallel>], iteration_bounds = array<i64: 1>, scalar_prefetch = 0 : i64, scratch_operands = 0 : i64, tpu.core_type = #tpu.core_type<tc>, window_params = [{transform_indices = @transform_0, window_bounds = array<i64: 2>}, {transform_indices = @transform_1, window_bounds = array<i64: 8, 128>}, {transform_indices = @transform_2, window_bounds = array<i64: 8, 128>}, {transform_indices = @transform_3, window_bounds = array<i64: 8, 128>}]} {
    %c0 = arith.constant 0 : index
    %0 = memref.load %arg1[%c0] : memref<2xf32, #tpu.memory_space<smem>>
    %c1 = arith.constant 1 : index
    %1 = memref.load %arg1[%c1] : memref<2xf32, #tpu.memory_space<smem>>
    %c0_0 = arith.constant 0 : index
    %c0_1 = arith.constant 0 : index
    %2 = vector.load %arg2[%c0_0, %c0_1] : memref<8x128xf32, #tpu.memory_space<vmem>>, vector<8x128xf32>
    %3 = vector.broadcast %0 : f32 to vector<8x128xf32>
    %4 = arith.mulf %3, %2 : vector<8x128xf32>
    %c0_2 = arith.constant 0 : index
    %c0_3 = arith.constant 0 : index
    %5 = vector.load %arg3[%c0_2, %c0_3] : memref<8x128xf32, #tpu.memory_space<vmem>>, vector<8x128xf32>
    %6 = vector.broadcast %1 : f32 to vector<8x128xf32>
    %7 = arith.mulf %6, %5 : vector<8x128xf32>
    %8 = arith.addf %4, %7 : vector<8x128xf32>
    %c0_4 = arith.constant 0 : index
    %c0_5 = arith.constant 0 : index
    %9 = vector.load %arg4[%c0_4, %c0_5] : memref<8x128xf32, #tpu.memory_space<vmem>>, vector<8x128xf32>
    tpu.vector_store %arg4[%c0_4, %c0_5], %8 {strides = array<i32>} : memref<8x128xf32, #tpu.memory_space<vmem>>, vector<8x128xf32>,
    return
  }
  func.func @transform_0(%arg0: i32) -> i32 {
    %c0_i32 = arith.constant 0 : i32
    %c0_i32_0 = arith.constant 0 : i32
    return %c0_i32 : i32
  }
  func.func @transform_1(%arg0: i32) -> (i32, i32) {
    %c0_i32 = arith.constant 0 : i32
    %c0_i32_0 = arith.constant 0 : i32
    return %arg0, %c0_i32 : i32, i32
  }
  func.func @transform_2(%arg0: i32) -> (i32, i32) {
    %c0_i32 = arith.constant 0 : i32
    %c0_i32_0 = arith.constant 0 : i32
    return %arg0, %c0_i32 : i32, i32
  }
  func.func @transform_3(%arg0: i32) -> (i32, i32) {
    %c0_i32 = arith.constant 0 : i32
    %c0_i32_0 = arith.constant 0 : i32
    return %arg0, %c0_i32 : i32, i32
  }
}

</mosaic_0001>

<bundles_post_ra>
// kernel: ema_update_flat.1
= control target key start
LH: loop header
LB: loop body
LE: loop exit
PB: predicated region body
PF: predicated region fallthrough
CT: control target
= control target key end

     0   :  { %8 = vsyncpa [#allocation5], 0  ;;  %s238_s0 = inlined_call_operand.hbm [shape: f32[2], index: 0, kind: input, shape index: {}]   ;;  %s239_s1 = inlined_call_operand.hbm [shape: f32[8,128], index: 1, kind: input, shape index: {}, may-alias: {1,3}]   ;;  %s240_s2 = inlined_call_operand.hbm [shape: f32[8,128], index: 2, kind: input, shape index: {}]   ;;  %s241_s3 = inlined_call_operand.hbm [shape: f32[8,128], index: 3, kind: output, shape index: {}, may-alias: {1,3}]  }
   0x1   :  { %9 = vsyncpa [#allocation3], 0 }
   0x2   :  { %10 = vsyncpa [#allocation8], 0 }
   0x3   :  { %11 = vsyncpa [#allocation4], 0  ;;  %s82_s14 = scalar_lea.hbm %s238_s0, 16 }
   0x4   :  { %p83_p0 = scmp.ne.s32.totalorder %s238_s0, %s82_s14  ;;  %p86_p1 = scmp.lt.u32.totalorder %s82_s14, %s238_s0 }
   0x6   :  { %p88_p2 = pnand %p86_p1, %p83_p0 }
   0x8   :  { %91 = shalt.err (!%p88_p2)
}
   0x9   :  { %s166_s19 = smov [#allocation2]   ;;  %s167_s22 = smov [#allocation6]  }
   0xa   :  { %19 = dma.hbm_to_smem %s238_s0, 16, %s166_s19, [#allocation5]  }
   0xb   :  { %s26_s23 = sshll.u32 %s167_s22, 4  ;;  %s168_s24 = smov [#allocation7]   ;;  %s27_s23 = int_to_ptr.vmem [resolvable:$true] %s26_s23 }
   0xc   :  { %s36_s25 = sshll.u32 %s168_s24, 4  ;;  %s92_s28 = scalar_lea.hbm %s239_s1, 128  ;;  %s37_s25 = int_to_ptr.vmem [resolvable:$true] %s36_s25 }
   0xd   :  { %p93_p3 = scmp.ne.s32.totalorder %s239_s1, %s92_s28  ;;  %p96_p4 = scmp.lt.u32.totalorder %s92_s28, %s239_s1 }
   0xf   :  { %p98_p5 = pnand %p96_p4, %p93_p3 }
  0x11   :  { %101 = shalt.err (!%p98_p5)
}
  0x12   :  { %s102_s0 = scalar_lea.vmem %s27_s23, 128  ;;  %p107_p7 = scmp.lt.s32.totalorder %s27_s23, %s27_s23 }
  0x13   :  { %p103_p6 = scmp.ne.s32.totalorder %s27_s23, %s102_s0  ;;  %p108_p8 = scmp.lt.s32.totalorder %s102_s0, %s102_s0 }
  0x15   :  { %p109_p9 = por %p108_p8, %p107_p7 }
  0x17   :  { %p110_p10 = pnand %p109_p9, %p103_p6 }
  0x19   :  { %113 = shalt.err (!%p110_p10)
}
  0x1a   :  { %29 = dma.hbm_to_vmem [thread:$0]  %s239_s1, 128, %s27_s23, [#allocation3]  }
  0x1b   :  { %s114_s10 = scalar_lea.hbm %s240_s2, 128 }
  0x1c   :  { %p115_p11 = scmp.ne.s32.totalorder %s240_s2, %s114_s10  ;;  %p118_p12 = scmp.lt.u32.totalorder %s114_s10, %s240_s2 }
  0x1e   :  { %p120_p13 = pnand %p118_p12, %p115_p11 }
  0x20   :  { %123 = shalt.err (!%p120_p13)
}
  0x21   :  { %s124_s15 = scalar_lea.vmem %s37_s25, 128  ;;  %p129_p1 = scmp.lt.s32.totalorder %s37_s25, %s37_s25 }
  0x22   :  { %p125_p0 = scmp.ne.s32.totalorder %s37_s25, %s124_s15  ;;  %p130_p2 = scmp.lt.s32.totalorder %s124_s15, %s124_s15 }
  0x24   :  { %p131_p3 = por %p130_p2, %p129_p1 }
  0x26   :  { %p132_p4 = pnand %p131_p3, %p125_p0 }
  0x28   :  { %135 = shalt.err (!%p132_p4)
}
  0x29   :  { %39 = dma.hbm_to_vmem [thread:$0]  %s240_s2, 128, %s37_s25, [#allocation8]  }
  0x2a   :  { %158 = dma.done.wait [#allocation5], 16  }
  0x2b   :  { %159 = vsyncadd [#allocation5], 4294967280 }
  0x2c   :  { %160 = dma.done.wait [#allocation3], 128  }
  0x2d   :  { %161 = vsyncadd [#allocation3], 4294967168 }
  0x2e   :  { %162 = dma.done.wait [#allocation8], 128  }
  0x2f   :  { %163 = vsyncadd [#allocation8], 4294967168 }
  0x30   :  { %49 = sfence }
  0x31   :  { %s50_s17 = sld [smem:[#allocation2]]  ;;  %s77_s18 = sld [smem:[#allocation2 + $0x1]]  ;;  %v52_v0 = vld [vmem:[#allocation6] sm:$0xff]  ;;  %v55_v1 = vld [vmem:[#allocation7] sm:$0xff] }
  0x32   :  { %s169_s19 = smov [#allocation9]  }
  0x33   :  { %s66_s20 = sshll.u32 %s169_s19, 4  ;;  %s67_s20 = int_to_ptr.vmem [resolvable:$true] %s66_s20 }
  0x34   :  { %s136_s2 = scalar_lea.vmem %s67_s20, 128  ;;  %p141_p6 = scmp.lt.s32.totalorder %s67_s20, %s67_s20 }
  0x35   :  { %p137_p5 = scmp.ne.s32.totalorder %s67_s20, %s136_s2  ;;  %p142_p7 = scmp.lt.s32.totalorder %s136_s2, %s136_s2 }
  0x37   :  { %v53_v2 = vstv %s50_s17  ;;  %v56_v3 = vstv %s77_s18  ;;  %p143_p8 = por %p142_p7, %p141_p6 }
  0x38   :  { %v54_v4 = vmul.f32 %v53_v2, %v52_v0  ;;  %v57_v5 = vmul.f32 %v56_v3, %v55_v1 }
  0x39   :  { %p144_p9 = pnand %p143_p8, %p137_p5 }
  0x3a   :  { %v58_v6 = vadd.f32 %v57_v5, %v54_v4 }
  0x3c   :  { %59 = vst [vmem:[#allocation9] sm:$0xff] %v58_v6 }
  0x3d   :  { %147 = shalt.err (!%p144_p9)
}
  0x3e   :  { %s148_s23 = scalar_lea.hbm %s241_s3, 128 }
  0x3f   :  { %p149_p10 = scmp.ne.s32.totalorder %s241_s3, %s148_s23  ;;  %p152_p11 = scmp.lt.u32.totalorder %s148_s23, %s241_s3 }
  0x41   :  { %p154_p12 = pnand %p152_p11, %p149_p10 }
  0x43   :  { %157 = shalt.err (!%p154_p12)
}
  0x44   :  { %69 = dma.vmem_to_hbm [thread:$0]  %s67_s20, 128, %s241_s3, [#allocation4]  }
  0x45   :  { %164 = dma.done.wait [#allocation4], 128  }
  0x46   :  { %165 = vsyncadd [#allocation4], 4294967168 }
  0x47   :  { %73 = vsyncpa [#allocation3], 1 }
  0x48   :  { %74 = vsyncpa [#allocation8], 1 }
  0x49   :  { %75 = vsyncpa [#allocation4], 1 }
  0x4a   :  { %76 = vsyncpa [#allocation5], 1 }

</bundles_post_ra>
